<compile_context>
chip_gen: v5e
topology: v5e:2x2
jax: 0.10.0
libtpu: 0.0.40
codegen_flags: <defaults>
</compile_context>

<pallas_src>
import jax
import jax.numpy as jnp
from jax import lax
from jax.experimental import pallas as pl
from jax.experimental.pallas import tpu as pltpu


def _gate_predictor_kernel(x_ref,      # (T*B, F)  time-major flattened input
                           h0_ref,     # (B, H)    initial hidden state
                           wih_ref,    # (F, H)    W_ih^T
                           whh_ref,    # (H, H)    W_hh^T
                           b_ref,      # (1, H)    b_ih + b_hh (fused)
                           wfc_ref,    # (H, G)    W_fc^T
                           bfc_ref,    # (1, G)
                           out_ref,    # (T*B, G)  time-major softmax probs (softmax over T)
                           h_sc):      # VMEM scratch (T*B, H) — all hidden states
    B = h0_ref.shape[0]
    T = out_ref.shape[0] // B

    whh = whh_ref[...]
    wfc = wfc_ref[...]

    # 1) Input projection for ALL timesteps in one MXU matmul, RNN biases fused in.
    xw = jnp.dot(x_ref[...], wih_ref[...],
                 preferred_element_type=jnp.float32) + b_ref[...]          # (T*B, H)

    # 2) Serial recurrence, statically unrolled. Only h @ W_hh and tanh remain on
    #    the serial critical path; hidden states are stashed for the hoisted FC.
    h = h0_ref[...]                                                        # (B, H)
    for t in range(T):
        x_t = xw[t * B:(t + 1) * B, :]                                     # static slice (B, H)
        h = jnp.tanh(x_t + jnp.dot(h, whh, preferred_element_type=jnp.float32))
        h_sc[pl.ds(t * B, B), :] = h

    # 3) FC projection for all timesteps in one MXU matmul.
    logits = jnp.dot(h_sc[...], wfc,
                     preferred_element_type=jnp.float32) + bfc_ref[...]    # (T*B, G)

    # 4) Softmax over the sequence axis (PyTorch dim=1 of (B,T,G)).
    #    Statically unrolled VPU max/sum over t (no XLU reduce, no reshape/transpose).
    rows = [logits[t * B:(t + 1) * B, :] for t in range(T)]                # T x (B, G)
    m = rows[0]
    for t in range(1, T):
        m = jnp.maximum(m, rows[t])
    es = [jnp.exp(r - m) for r in rows]                                    # EUP
    s = es[0]
    for t in range(1, T):
        s = s + es[t]
    inv = pl.reciprocal(s, approx=True)        # EUP vrcp (off the VALU)
    inv = inv * (2.0 - s * inv)                # Newton-Raphson refinement
    inv = inv * (2.0 - s * inv)                # -> full f32 accuracy
    for t in range(T):
        out_ref[pl.ds(t * B, B), :] = (es[t] * inv).astype(out_ref.dtype)


def gate_predictor(x, h, params):
    """x: (B, T, F) float32, h: (B, H) float32 -> (B, T, G) float32."""
    B, T, F = x.shape
    H = h.shape[1]
    G = params["w_fc"].shape[0]

    # Time-major flattened input so each timestep's rows form a contiguous (B, H)
    # slice of the hoisted input projection.
    x_tm = jnp.transpose(x, (1, 0, 2)).reshape(T * B, F)

    wih_t = params["w_ih"].T                                   # (F, H)
    whh_t = params["w_hh"].T                                   # (H, H)
    b_rnn = (params["b_ih"] + params["b_hh"]).reshape(1, H)    # fused RNN bias
    wfc_t = params["w_fc"].T                                   # (H, G)
    bfc = params["b_fc"].reshape(1, G)

    vmem = pl.BlockSpec(memory_space=pltpu.MemorySpace.VMEM)
    out_tm = pl.pallas_call(
        _gate_predictor_kernel,
        out_shape=jax.ShapeDtypeStruct((T * B, G), jnp.float32),
        in_specs=[vmem] * 7,
        out_specs=vmem,
        scratch_shapes=[pltpu.VMEM((T * B, H), jnp.float32)],
    )(x_tm, h, wih_t, whh_t, b_rnn, wfc_t, bfc)

    # Kernel output is time-major (T*B,G); relayout to PyTorch's (B,T,G) outside the kernel.
    return jnp.transpose(out_tm.reshape(T, B, G), (1, 0, 2))


def init_params(key, node_feature_dim, hidden_dim, num_gate_types):
    """Deterministic init mimicking PyTorch's uniform(-1/sqrt(H), 1/sqrt(H))."""
    ks = jax.random.split(key, 6)
    bound = 1.0 / (hidden_dim ** 0.5)
    u = lambda k, shape, b: jax.random.uniform(k, shape, jnp.float32, -b, b)
    return {
        "w_ih": u(ks[0], (hidden_dim, node_feature_dim), bound),
        "w_hh": u(ks[1], (hidden_dim, hidden_dim), bound),
        "b_ih": u(ks[2], (hidden_dim,), bound),
        "b_hh": u(ks[3], (hidden_dim,), bound),
        "w_fc": u(ks[4], (num_gate_types, hidden_dim), bound),
        "b_fc": u(ks[5], (num_gate_types,), bound),
    }


def gate_predictor_ref(x, h, params):
    """Pure-JAX reference (same math as the PyTorch module)."""
    def step(h_prev, x_t):
        h_new = jnp.tanh(x_t @ params["w_ih"].T + params["b_ih"]
                         + h_prev @ params["w_hh"].T + params["b_hh"])
        return h_new, h_new

    _, hs = lax.scan(step, h, jnp.transpose(x, (1, 0, 2)))   # hs: (T, B, H)
    out = jnp.transpose(hs, (1, 0, 2))                       # (B, T, H)
    logits = out @ params["w_fc"].T + params["b_fc"]         # (B, T, G)
    return jax.nn.softmax(logits, axis=1)                    # dim=1 == seq axis


if __name__ == "__main__":
    B, T, F, H, G = 2, 8, 4, 32, 8

    key = jax.random.PRNGKey(0)
    k_x, k_h, k_p = jax.random.split(key, 3)
    x = jax.random.normal(k_x, (B, T, F), jnp.float32)
    h = jax.random.normal(k_h, (B, H), jnp.float32)
    params = init_params(k_p, F, H, G)

    out = gate_predictor(x, h, params)
    out = jax.block_until_ready(out)

    ref = gate_predictor_ref(x, h, params)
    assert out.shape == (B, T, G)
    assert jnp.allclose(out, ref, atol=1e-5, rtol=1e-5), "mismatch vs reference"

    print("KERNEL_OK")
</pallas_src>

<mosaic_0001>
module attributes {stable_mosaic.version = 11 : i64} {
  func.func @_gate_predictor_kernel(%arg0: memref<16x4xf32, #tpu.memory_space<vmem>>, %arg1: memref<2x32xf32, #tpu.memory_space<vmem>>, %arg2: memref<4x32xf32, #tpu.memory_space<vmem>>, %arg3: memref<32x32xf32, #tpu.memory_space<vmem>>, %arg4: memref<1x32xf32, #tpu.memory_space<vmem>>, %arg5: memref<32x8xf32, #tpu.memory_space<vmem>>, %arg6: memref<1x8xf32, #tpu.memory_space<vmem>>, %arg7: memref<16x8xf32, #tpu.memory_space<vmem>>, %arg8: memref<16x32xf32, #tpu.memory_space<vmem>>) attributes {dimension_semantics = [], scalar_prefetch = 0 : i64, scratch_operands = 1 : i64, tpu.core_type = #tpu.core_type<tc>} {
    %c0 = arith.constant 0 : index
    %c0_0 = arith.constant 0 : index
    %0 = vector.load %arg3[%c0, %c0_0] : memref<32x32xf32, #tpu.memory_space<vmem>>, vector<32x32xf32>
    %c0_1 = arith.constant 0 : index
    %c0_2 = arith.constant 0 : index
    %1 = vector.load %arg5[%c0_1, %c0_2] : memref<32x8xf32, #tpu.memory_space<vmem>>, vector<32x8xf32>
    %c0_3 = arith.constant 0 : index
    %c0_4 = arith.constant 0 : index
    %2 = vector.load %arg0[%c0_3, %c0_4] : memref<16x4xf32, #tpu.memory_space<vmem>>, vector<16x4xf32>
    %c0_5 = arith.constant 0 : index
    %c0_6 = arith.constant 0 : index
    %3 = vector.load %arg2[%c0_5, %c0_6] : memref<4x32xf32, #tpu.memory_space<vmem>>, vector<4x32xf32>
    %cst = arith.constant dense<0.000000e+00> : vector<16x32xf32>
    %4 = tpu.matmul %2, %3, %cst {dimension_numbers = #tpu.dot_dimension_numbers<[1], [0], [0], [1], [0, 0, 1, 1], [], []>} : vector<16x4xf32>, vector<4x32xf32>, vector<16x32xf32> -> vector<16x32xf32>
    %c0_7 = arith.constant 0 : index
    %c0_8 = arith.constant 0 : index
    %5 = vector.load %arg4[%c0_7, %c0_8] : memref<1x32xf32, #tpu.memory_space<vmem>>, vector<1x32xf32>
    %6 = vector.broadcast %5 : vector<1x32xf32> to vector<16x32xf32>
    %7 = arith.addf %4, %6 : vector<16x32xf32>
    %c0_9 = arith.constant 0 : index
    %c0_10 = arith.constant 0 : index
    %8 = vector.load %arg1[%c0_9, %c0_10] : memref<2x32xf32, #tpu.memory_space<vmem>>, vector<2x32xf32>
    %9 = vector.extract_strided_slice %7 {offsets = [0, 0], sizes = [2, 32], strides = [1, 1]} : vector<16x32xf32> to vector<2x32xf32>
    %cst_11 = arith.constant dense<0.000000e+00> : vector<2x32xf32>
    %10 = tpu.matmul %8, %0, %cst_11 {dimension_numbers = #tpu.dot_dimension_numbers<[1], [0], [0], [1], [0, 0, 1, 1], [], []>} : vector<2x32xf32>, vector<32x32xf32>, vector<2x32xf32> -> vector<2x32xf32>
    %11 = arith.addf %9, %10 : vector<2x32xf32>
    %12 = math.tanh %11 : vector<2x32xf32>
    %c0_12 = arith.constant 0 : index
    %c0_13 = arith.constant 0 : index
    %13 = vector.load %arg8[%c0_12, %c0_13] : memref<16x32xf32, #tpu.memory_space<vmem>>, vector<2x32xf32>
    tpu.vector_store %arg8[%c0_12, %c0_13], %12 {strides = array<i32>} : memref<16x32xf32, #tpu.memory_space<vmem>>, vector<2x32xf32>,
    %14 = vector.extract_strided_slice %7 {offsets = [2, 0], sizes = [2, 32], strides = [1, 1]} : vector<16x32xf32> to vector<2x32xf32>
    %cst_14 = arith.constant dense<0.000000e+00> : vector<2x32xf32>
    %15 = tpu.matmul %12, %0, %cst_14 {dimension_numbers = #tpu.dot_dimension_numbers<[1], [0], [0], [1], [0, 0, 1, 1], [], []>} : vector<2x32xf32>, vector<32x32xf32>, vector<2x32xf32> -> vector<2x32xf32>
    %16 = arith.addf %14, %15 : vector<2x32xf32>
    %17 = math.tanh %16 : vector<2x32xf32>
    %c2 = arith.constant 2 : index
    %c0_15 = arith.constant 0 : index
    %18 = vector.load %arg8[%c2, %c0_15] : memref<16x32xf32, #tpu.memory_space<vmem>>, vector<2x32xf32>
    tpu.vector_store %arg8[%c2, %c0_15], %17 {strides = array<i32>} : memref<16x32xf32, #tpu.memory_space<vmem>>, vector<2x32xf32>,
    %19 = vector.extract_strided_slice %7 {offsets = [4, 0], sizes = [2, 32], strides = [1, 1]} : vector<16x32xf32> to vector<2x32xf32>
    %cst_16 = arith.constant dense<0.000000e+00> : vector<2x32xf32>
    %20 = tpu.matmul %17, %0, %cst_16 {dimension_numbers = #tpu.dot_dimension_numbers<[1], [0], [0], [1], [0, 0, 1, 1], [], []>} : vector<2x32xf32>, vector<32x32xf32>, vector<2x32xf32> -> vector<2x32xf32>
    %21 = arith.addf %19, %20 : vector<2x32xf32>
    %22 = math.tanh %21 : vector<2x32xf32>
    %c4 = arith.constant 4 : index
    %c0_17 = arith.constant 0 : index
    %23 = vector.load %arg8[%c4, %c0_17] : memref<16x32xf32, #tpu.memory_space<vmem>>, vector<2x32xf32>
    tpu.vector_store %arg8[%c4, %c0_17], %22 {strides = array<i32>} : memref<16x32xf32, #tpu.memory_space<vmem>>, vector<2x32xf32>,
    %24 = vector.extract_strided_slice %7 {offsets = [6, 0], sizes = [2, 32], strides = [1, 1]} : vector<16x32xf32> to vector<2x32xf32>
    %cst_18 = arith.constant dense<0.000000e+00> : vector<2x32xf32>
    %25 = tpu.matmul %22, %0, %cst_18 {dimension_numbers = #tpu.dot_dimension_numbers<[1], [0], [0], [1], [0, 0, 1, 1], [], []>} : vector<2x32xf32>, vector<32x32xf32>, vector<2x32xf32> -> vector<2x32xf32>
    %26 = arith.addf %24, %25 : vector<2x32xf32>
    %27 = math.tanh %26 : vector<2x32xf32>
    %c6 = arith.constant 6 : index
    %c0_19 = arith.constant 0 : index
    %28 = vector.load %arg8[%c6, %c0_19] : memref<16x32xf32, #tpu.memory_space<vmem>>, vector<2x32xf32>
    tpu.vector_store %arg8[%c6, %c0_19], %27 {strides = array<i32>} : memref<16x32xf32, #tpu.memory_space<vmem>>, vector<2x32xf32>,
    %29 = vector.extract_strided_slice %7 {offsets = [8, 0], sizes = [2, 32], strides = [1, 1]} : vector<16x32xf32> to vector<2x32xf32>
    %cst_20 = arith.constant dense<0.000000e+00> : vector<2x32xf32>
    %30 = tpu.matmul %27, %0, %cst_20 {dimension_numbers = #tpu.dot_dimension_numbers<[1], [0], [0], [1], [0, 0, 1, 1], [], []>} : vector<2x32xf32>, vector<32x32xf32>, vector<2x32xf32> -> vector<2x32xf32>
    %31 = arith.addf %29, %30 : vector<2x32xf32>
    %32 = math.tanh %31 : vector<2x32xf32>
    %c8 = arith.constant 8 : index
    %c0_21 = arith.constant 0 : index
    %33 = vector.load %arg8[%c8, %c0_21] : memref<16x32xf32, #tpu.memory_space<vmem>>, vector<2x32xf32>
    tpu.vector_store %arg8[%c8, %c0_21], %32 {strides = array<i32>} : memref<16x32xf32, #tpu.memory_space<vmem>>, vector<2x32xf32>,
    %34 = vector.extract_strided_slice %7 {offsets = [10, 0], sizes = [2, 32], strides = [1, 1]} : vector<16x32xf32> to vector<2x32xf32>
    %cst_22 = arith.constant dense<0.000000e+00> : vector<2x32xf32>
    %35 = tpu.matmul %32, %0, %cst_22 {dimension_numbers = #tpu.dot_dimension_numbers<[1], [0], [0], [1], [0, 0, 1, 1], [], []>} : vector<2x32xf32>, vector<32x32xf32>, vector<2x32xf32> -> vector<2x32xf32>
    %36 = arith.addf %34, %35 : vector<2x32xf32>
    %37 = math.tanh %36 : vector<2x32xf32>
    %c10 = arith.constant 10 : index
    %c0_23 = arith.constant 0 : index
    %38 = vector.load %arg8[%c10, %c0_23] : memref<16x32xf32, #tpu.memory_space<vmem>>, vector<2x32xf32>
    tpu.vector_store %arg8[%c10, %c0_23], %37 {strides = array<i32>} : memref<16x32xf32, #tpu.memory_space<vmem>>, vector<2x32xf32>,
    %39 = vector.extract_strided_slice %7 {offsets = [12, 0], sizes = [2, 32], strides = [1, 1]} : vector<16x32xf32> to vector<2x32xf32>
    %cst_24 = arith.constant dense<0.000000e+00> : vector<2x32xf32>
    %40 = tpu.matmul %37, %0, %cst_24 {dimension_numbers = #tpu.dot_dimension_numbers<[1], [0], [0], [1], [0, 0, 1, 1], [], []>} : vector<2x32xf32>, vector<32x32xf32>, vector<2x32xf32> -> vector<2x32xf32>
    %41 = arith.addf %39, %40 : vector<2x32xf32>
    %42 = math.tanh %41 : vector<2x32xf32>
    %c12 = arith.constant 12 : index
    %c0_25 = arith.constant 0 : index
    %43 = vector.load %arg8[%c12, %c0_25] : memref<16x32xf32, #tpu.memory_space<vmem>>, vector<2x32xf32>
    tpu.vector_store %arg8[%c12, %c0_25], %42 {strides = array<i32>} : memref<16x32xf32, #tpu.memory_space<vmem>>, vector<2x32xf32>,
    %44 = vector.extract_strided_slice %7 {offsets = [14, 0], sizes = [2, 32], strides = [1, 1]} : vector<16x32xf32> to vector<2x32xf32>
    %cst_26 = arith.constant dense<0.000000e+00> : vector<2x32xf32>
    %45 = tpu.matmul %42, %0, %cst_26 {dimension_numbers = #tpu.dot_dimension_numbers<[1], [0], [0], [1], [0, 0, 1, 1], [], []>} : vector<2x32xf32>, vector<32x32xf32>, vector<2x32xf32> -> vector<2x32xf32>
    %46 = arith.addf %44, %45 : vector<2x32xf32>
    %47 = math.tanh %46 : vector<2x32xf32>
    %c14 = arith.constant 14 : index
    %c0_27 = arith.constant 0 : index
    %48 = vector.load %arg8[%c14, %c0_27] : memref<16x32xf32, #tpu.memory_space<vmem>>, vector<2x32xf32>
    tpu.vector_store %arg8[%c14, %c0_27], %47 {strides = array<i32>} : memref<16x32xf32, #tpu.memory_space<vmem>>, vector<2x32xf32>,
    %c0_28 = arith.constant 0 : index
    %c0_29 = arith.constant 0 : index
    %49 = vector.load %arg8[%c0_28, %c0_29] : memref<16x32xf32, #tpu.memory_space<vmem>>, vector<16x32xf32>
    %cst_30 = arith.constant dense<0.000000e+00> : vector<16x8xf32>
    %50 = tpu.matmul %49, %1, %cst_30 {dimension_numbers = #tpu.dot_dimension_numbers<[1], [0], [0], [1], [0, 0, 1, 1], [], []>} : vector<16x32xf32>, vector<32x8xf32>, vector<16x8xf32> -> vector<16x8xf32>
    %c0_31 = arith.constant 0 : index
    %c0_32 = arith.constant 0 : index
    %51 = vector.load %arg6[%c0_31, %c0_32] : memref<1x8xf32, #tpu.memory_space<vmem>>, vector<1x8xf32>
    %52 = vector.broadcast %51 : vector<1x8xf32> to vector<16x8xf32>
    %53 = arith.addf %50, %52 : vector<16x8xf32>
    %54 = vector.extract_strided_slice %53 {offsets = [0, 0], sizes = [2, 8], strides = [1, 1]} : vector<16x8xf32> to vector<2x8xf32>
    %55 = vector.extract_strided_slice %53 {offsets = [2, 0], sizes = [2, 8], strides = [1, 1]} : vector<16x8xf32> to vector<2x8xf32>
    %56 = vector.extract_strided_slice %53 {offsets = [4, 0], sizes = [2, 8], strides = [1, 1]} : vector<16x8xf32> to vector<2x8xf32>
    %57 = vector.extract_strided_slice %53 {offsets = [6, 0], sizes = [2, 8], strides = [1, 1]} : vector<16x8xf32> to vector<2x8xf32>
    %58 = vector.extract_strided_slice %53 {offsets = [8, 0], sizes = [2, 8], strides = [1, 1]} : vector<16x8xf32> to vector<2x8xf32>
    %59 = vector.extract_strided_slice %53 {offsets = [10, 0], sizes = [2, 8], strides = [1, 1]} : vector<16x8xf32> to vector<2x8xf32>
    %60 = vector.extract_strided_slice %53 {offsets = [12, 0], sizes = [2, 8], strides = [1, 1]} : vector<16x8xf32> to vector<2x8xf32>
    %61 = vector.extract_strided_slice %53 {offsets = [14, 0], sizes = [2, 8], strides = [1, 1]} : vector<16x8xf32> to vector<2x8xf32>
    %62 = arith.maximumf %54, %55 : vector<2x8xf32>
    %63 = arith.maximumf %62, %56 : vector<2x8xf32>
    %64 = arith.maximumf %63, %57 : vector<2x8xf32>
    %65 = arith.maximumf %64, %58 : vector<2x8xf32>
    %66 = arith.maximumf %65, %59 : vector<2x8xf32>
    %67 = arith.maximumf %66, %60 : vector<2x8xf32>
    %68 = arith.maximumf %67, %61 : vector<2x8xf32>
    %69 = arith.subf %54, %68 : vector<2x8xf32>
    %70 = math.exp %69 : vector<2x8xf32>
    %71 = arith.subf %55, %68 : vector<2x8xf32>
    %72 = math.exp %71 : vector<2x8xf32>
    %73 = arith.subf %56, %68 : vector<2x8xf32>
    %74 = math.exp %73 : vector<2x8xf32>
    %75 = arith.subf %57, %68 : vector<2x8xf32>
    %76 = math.exp %75 : vector<2x8xf32>
    %77 = arith.subf %58, %68 : vector<2x8xf32>
    %78 = math.exp %77 : vector<2x8xf32>
    %79 = arith.subf %59, %68 : vector<2x8xf32>
    %80 = math.exp %79 : vector<2x8xf32>
    %81 = arith.subf %60, %68 : vector<2x8xf32>
    %82 = math.exp %81 : vector<2x8xf32>
    %83 = arith.subf %61, %68 : vector<2x8xf32>
    %84 = math.exp %83 : vector<2x8xf32>
    %85 = arith.addf %70, %72 : vector<2x8xf32>
    %86 = arith.addf %85, %74 : vector<2x8xf32>
    %87 = arith.addf %86, %76 : vector<2x8xf32>
    %88 = arith.addf %87, %78 : vector<2x8xf32>
    %89 = arith.addf %88, %80 : vector<2x8xf32>
    %90 = arith.addf %89, %82 : vector<2x8xf32>
    %91 = arith.addf %90, %84 : vector<2x8xf32>
    %92 = tpu.reciprocal %91 {approx = true} : vector<2x8xf32> -> vector<2x8xf32>
    %93 = arith.mulf %91, %92 : vector<2x8xf32>
    %cst_33 = arith.constant 2.000000e+00 : f32
    %94 = vector.broadcast %cst_33 : f32 to vector<2x8xf32>
    %95 = arith.subf %94, %93 : vector<2x8xf32>
    %96 = arith.mulf %92, %95 : vector<2x8xf32>
    %97 = arith.mulf %91, %96 : vector<2x8xf32>
    %cst_34 = arith.constant 2.000000e+00 : f32
    %98 = vector.broadcast %cst_34 : f32 to vector<2x8xf32>
    %99 = arith.subf %98, %97 : vector<2x8xf32>
    %100 = arith.mulf %96, %99 : vector<2x8xf32>
    %101 = arith.mulf %70, %100 : vector<2x8xf32>
    %c0_35 = arith.constant 0 : index
    %c0_36 = arith.constant 0 : index
    %102 = vector.load %arg7[%c0_35, %c0_36] : memref<16x8xf32, #tpu.memory_space<vmem>>, vector<2x8xf32>
    tpu.vector_store %arg7[%c0_35, %c0_36], %101 {strides = array<i32>} : memref<16x8xf32, #tpu.memory_space<vmem>>, vector<2x8xf32>,
    %103 = arith.mulf %72, %100 : vector<2x8xf32>
    %c2_37 = arith.constant 2 : index
    %c0_38 = arith.constant 0 : index
    %104 = vector.load %arg7[%c2_37, %c0_38] : memref<16x8xf32, #tpu.memory_space<vmem>>, vector<2x8xf32>
    tpu.vector_store %arg7[%c2_37, %c0_38], %103 {strides = array<i32>} : memref<16x8xf32, #tpu.memory_space<vmem>>, vector<2x8xf32>,
    %105 = arith.mulf %74, %100 : vector<2x8xf32>
    %c4_39 = arith.constant 4 : index
    %c0_40 = arith.constant 0 : index
    %106 = vector.load %arg7[%c4_39, %c0_40] : memref<16x8xf32, #tpu.memory_space<vmem>>, vector<2x8xf32>
    tpu.vector_store %arg7[%c4_39, %c0_40], %105 {strides = array<i32>} : memref<16x8xf32, #tpu.memory_space<vmem>>, vector<2x8xf32>,
    %107 = arith.mulf %76, %100 : vector<2x8xf32>
    %c6_41 = arith.constant 6 : index
    %c0_42 = arith.constant 0 : index
    %108 = vector.load %arg7[%c6_41, %c0_42] : memref<16x8xf32, #tpu.memory_space<vmem>>, vector<2x8xf32>
    tpu.vector_store %arg7[%c6_41, %c0_42], %107 {strides = array<i32>} : memref<16x8xf32, #tpu.memory_space<vmem>>, vector<2x8xf32>,
    %109 = arith.mulf %78, %100 : vector<2x8xf32>
    %c8_43 = arith.constant 8 : index
    %c0_44 = arith.constant 0 : index
    %110 = vector.load %arg7[%c8_43, %c0_44] : memref<16x8xf32, #tpu.memory_space<vmem>>, vector<2x8xf32>
    tpu.vector_store %arg7[%c8_43, %c0_44], %109 {strides = array<i32>} : memref<16x8xf32, #tpu.memory_space<vmem>>, vector<2x8xf32>,
    %111 = arith.mulf %80, %100 : vector<2x8xf32>
    %c10_45 = arith.constant 10 : index
    %c0_46 = arith.constant 0 : index
    %112 = vector.load %arg7[%c10_45, %c0_46] : memref<16x8xf32, #tpu.memory_space<vmem>>, vector<2x8xf32>
    tpu.vector_store %arg7[%c10_45, %c0_46], %111 {strides = array<i32>} : memref<16x8xf32, #tpu.memory_space<vmem>>, vector<2x8xf32>,
    %113 = arith.mulf %82, %100 : vector<2x8xf32>
    %c12_47 = arith.constant 12 : index
    %c0_48 = arith.constant 0 : index
    %114 = vector.load %arg7[%c12_47, %c0_48] : memref<16x8xf32, #tpu.memory_space<vmem>>, vector<2x8xf32>
    tpu.vector_store %arg7[%c12_47, %c0_48], %113 {strides = array<i32>} : memref<16x8xf32, #tpu.memory_space<vmem>>, vector<2x8xf32>,
    %115 = arith.mulf %84, %100 : vector<2x8xf32>
    %c14_49 = arith.constant 14 : index
    %c0_50 = arith.constant 0 : index
    %116 = vector.load %arg7[%c14_49, %c0_50] : memref<16x8xf32, #tpu.memory_space<vmem>>, vector<2x8xf32>
    tpu.vector_store %arg7[%c14_49, %c0_50], %115 {strides = array<i32>} : memref<16x8xf32, #tpu.memory_space<vmem>>, vector<2x8xf32>,
    return
  }
}

</mosaic_0001>

<bundles_post_ra>
// kernel: tpu_custom_call.1
= control target key start
LH: loop header
LB: loop body
LE: loop exit
PB: predicated region body
PF: predicated region fallthrough
CT: control target
= control target key end

     0   :  { %vm48_vm0 = vcmask 1043456   ;;  %vm41_vm1 = vcmask 31744   ;;  %vm76_vm2 = vcmask 261120   ;;  %vm102_vm3 = vcmask 254976   ;;  %s637_s3 = inlined_call_operand.vmem [shape: f32[32,32], index: 3, kind: input, shape index: {}]   ;;  %s638_s2 = inlined_call_operand.vmem [shape: f32[4,32], index: 2, kind: input, shape index: {}]   ;;  %s639_s0 = inlined_call_operand.vmem [shape: f32[16,4], index: 0, kind: input, shape index: {}]   ;;  %s640_s4 = inlined_call_operand.vmem [shape: f32[1,32], index: 4, kind: input, shape index: {}]   ;;  %s641_s1 = inlined_call_operand.vmem [shape: f32[2,32], index: 1, kind: input, shape index: {}]   ;;  %s642_s5 = inlined_call_operand.vmem [shape: f32[32,8], index: 5, kind: input, shape index: {}]   ;;  %s643_s6 = inlined_call_operand.vmem [shape: f32[1,8], index: 6, kind: input, shape index: {}]   ;;  %s644_s7 = inlined_call_operand.vmem [shape: f32[16,8], index: 7, kind: output, shape index: {}]  }
   0x1   :  { %v29_v0 = vld [vmem:[%s637_s3 + $0x18] sm:$0xff]  ;;  %v28_v1 = vld [vmem:[%s637_s3 + $0x10] sm:$0xff]  ;;  %v36_v2 = vld [vmem:[%s638_s2] sm:$0xf]  ;;  %vm132_vm4 = vcmask 257026   ;;  %vm163_vm5 = vcmask 259076  }
   0x2   :  { %92 = vmatpush.msra.mxu1 %v29_v0  ;;  %462 = vmatpush.msk.msra.mxu0 %vm48_vm0, %v36_v2  ;;  %v34_v3 = vld [vmem:[%s639_s0] sm:$0xff]  ;;  %v27_v4 = vld [vmem:[%s637_s3 + $0x8] sm:$0xff]  ;;  %v33_v23 = vld [vmem:[%s642_s5 + $0x18] sm:$0xff]  ;;  %vm194_vm6 = vcmask 261126   ;;  %vm432_vm7 = vcmask 58368   ;;  %vm438_vm8 = vcmask 60418  }
   0x3   :  { %463 = vmatmul.msk.f32.vlgmr.msra.gmra.mxu0 %vm41_vm1, %v34_v3  ;;  %119 = vmatpush.msra.mxu3 %v29_v0  ;;  %v26_v5 = vld [vmem:[%s637_s3] sm:$0xff]  ;;  %v32_v24 = vld [vmem:[%s642_s5 + $0x10] sm:$0xff]  ;;  %v35_v25 = vld [vmem:[%s639_s0 + $0x8] sm:$0xff]  ;;  %vm443_vm9 = vcmask 62468   ;;  %vm448_vm10 = vcmask 64518  }
   0x4   :  { %93 = vmatpush.msra.mxu1 %v28_v1  ;;  %212 = vmatpush.msra.mxu2 %v29_v0  ;;  %v75_v6 = vld [vmem:[%s641_s1] sm:$0x3]  ;;  %v31_v26 = vld [vmem:[%s642_s5 + $0x8] sm:$0xff] }
   0x5   :  { %120 = vmatpush.msra.mxu3 %v28_v1  ;;  %268 = vmatpush.msrb.mxu0 %v29_v0  ;;  %v475_v7 = vld [vmem:[%s640_s4] ss:$0 sm:$0xff] }
   0x6   :  { %94 = vmatpush.msra.mxu1 %v27_v4  ;;  %213 = vmatpush.msra.mxu2 %v28_v1  ;;  %v30_v27 = vld [vmem:[%s642_s5] sm:$0xff] }
   0x7   :  { %121 = vmatpush.msra.mxu3 %v27_v4  ;;  %269 = vmatpush.msrb.mxu0 %v28_v1  ;;  %v476_v54 = vld [vmem:[%s643_s6] ss:$0 sm:$0xff] }
   0x8   :  { %95 = vmatpush.msra.mxu1 %v26_v5  ;;  %214 = vmatpush.msra.mxu2 %v27_v4 }
   0x9   :  { %465 = vmatmul.msk.f32.vlgmr.msra.gmra.mxu1 %vm76_vm2, %v75_v6  ;;  %122 = vmatpush.msra.mxu3 %v26_v5 }
   0xa   :  { %181 = vmatpush.msrb.mxu1 %v29_v0  ;;  %215 = vmatpush.msra.mxu2 %v26_v5 }
   0xb   :  { %150 = vmatpush.msrb.mxu3 %v29_v0  ;;  %270 = vmatpush.msrb.mxu0 %v27_v4 }
   0xc   :  { %182 = vmatpush.msrb.mxu1 %v28_v1  ;;  %336 = vmatpush.msrb.mxu2 %v33_v23 }
   0xd   :  { %151 = vmatpush.msrb.mxu3 %v28_v1  ;;  %271 = vmatpush.msrb.mxu0 %v26_v5 }
   0xe   :  { %183 = vmatpush.msrb.mxu1 %v27_v4  ;;  %464 = vmatmul.msk.f32.gmra.mxu0 %vm41_vm1, %v35_v25 }
   0xf   :  { %152 = vmatpush.msrb.mxu3 %v27_v4  ;;  %337 = vmatpush.msrb.mxu2 %v32_v24 }
  0x10   :  { %184 = vmatpush.msrb.mxu1 %v26_v5 }
  0x11   :  { %153 = vmatpush.msrb.mxu3 %v26_v5  ;;  %338 = vmatpush.msrb.mxu2 %v31_v26 }
  0x12   :  { %298 = vmatpush.msra.mxu1 %v29_v0 }
  0x13   :  { %339 = vmatpush.msrb.mxu2 %v30_v27 }
  0x14   :  { %299 = vmatpush.msra.mxu1 %v28_v1 }
  0x16   :  { %300 = vmatpush.msra.mxu1 %v27_v4 }
  0x18   :  { %301 = vmatpush.msra.mxu1 %v26_v5 }
  0x80   :  { %v69_v8 = vpop.f32.mrf.mxu0 }
  0x81   :  { %v70_v9 = vadd.f32 %v475_v7, %v69_v8 }
  0x86   :  { %v97_v10 = vpop.f32.mrf.mxu1 }
  0x87   :  { %v100_v11 = vadd.f32 %v97_v10, %v70_v9 }
  0x89   :  { %477 = vtanh.f32 %v100_v11 }
  0x8b   :  { %v72_v34 = vpop.f32.mrf.mxu0 }
  0x8c   :  { %v73_v35 = vadd.f32 %v475_v7, %v72_v34 }
  0x8f   :  { %v478_v12 = vpop.eup %477 }
  0x90   :  { %103 = vst.msk [vmem:[#allocation2] sm:$0x3] %vm102_vm3, %v478_v12  ;;  %466 = vmatmul.msk.f32.vlgmr.msra.gmra.mxu3 %vm76_vm2, %v478_v12 }
  0x91   :  { %238 = vmatpush.msra.mxu3 %v29_v0 }
  0x93   :  { %239 = vmatpush.msra.mxu3 %v28_v1 }
  0x95   :  { %240 = vmatpush.msra.mxu3 %v27_v4 }
  0x97   :  { %241 = vmatpush.msra.mxu3 %v26_v5 }
 0x113   :  { %v124_v13 = vpop.f32.mrf.mxu3 }
 0x114   :  { %v128_v14 = vrot.slane %v124_v13, 6 }
 0x116   :  { %v130_v15 = vadd.f32 %v128_v14, %v70_v9 }
 0x118   :  { %479 = vtanh.f32 %v130_v15 }
 0x11e   :  { %v480_v16 = vpop.eup %479 }
 0x11f   :  { %133 = vst.msk [vmem:[#allocation2] sm:$0xc] %vm132_vm4, %v480_v16  ;;  %v135_v17 = vrot.slane %v480_v16, 2 }
 0x121   :  { %467 = vmatmul.msk.f32.vlgmr.msrb.gmra.mxu3 %vm76_vm2, %v135_v17 }
 0x1a4   :  { %v155_v18 = vpop.f32.mrf.mxu3 }
 0x1a5   :  { %v159_v19 = vrot.slane %v155_v18, 4 }
 0x1a7   :  { %v161_v20 = vadd.f32 %v159_v19, %v70_v9 }
 0x1a9   :  { %481 = vtanh.f32 %v161_v20 }
 0x1af   :  { %v482_v21 = vpop.eup %481 }
 0x1b0   :  { %164 = vst.msk [vmem:[#allocation2] sm:$0x30] %vm163_vm5, %v482_v21  ;;  %v166_v22 = vrot.slane %v482_v21, 4 }
 0x1b2   :  { %468 = vmatmul.msk.f32.vlgmr.msrb.gmra.mxu1 %vm76_vm2, %v166_v22 }
 0x22f   :  { %v186_v28 = vpop.f32.mrf.mxu1 }
 0x230   :  { %v190_v29 = vrot.slane %v186_v28, 2 }
 0x232   :  { %v192_v30 = vadd.f32 %v190_v29, %v70_v9 }
 0x234   :  { %483 = vtanh.f32 %v192_v30 }
 0x23a   :  { %v484_v31 = vpop.eup %483 }
 0x23b   :  { %195 = vst.msk [vmem:[#allocation2] sm:$0xc0] %vm194_vm6, %v484_v31  ;;  %v197_v32 = vrot.slane %v484_v31, 6 }
 0x23d   :  { %469 = vmatmul.msk.f32.vlgmr.msra.gmra.mxu2 %vm76_vm2, %v197_v32 }
 0x242   :  { %v312_v33 = vld [vmem:[#allocation2] sm:$0xff] }
 0x245   :  { %473 = vmatmul.msk.f32.vlgmr.msrb.gmra.mxu2 %vm76_vm2, %v312_v33 }
 0x2c0   :  { %v217_v36 = vpop.f32.mrf.mxu2 }
 0x2c1   :  { %v220_v37 = vadd.f32 %v217_v36, %v73_v35 }
 0x2c3   :  { %485 = vtanh.f32 %v220_v37 }
 0x2c8   :  { %v341_v55 = vpop.f32.mrf.mxu2 }
 0x2c9   :  { %v486_v38 = vpop.eup %485  ;;  %v342_v56 = vadd.f32 %v476_v54, %v341_v55 }
 0x2ca   :  { %222 = vst.msk [vmem:[#allocation2 + $0x8] sm:$0x3] %vm102_vm3, %v486_v38  ;;  %470 = vmatmul.msk.f32.vlgmr.msra.gmra.mxu3 %vm76_vm2, %v486_v38 }
 0x2cb   :  { %v348_v57 = vrot.slane %v342_v56, 2  ;;  %v351_v59 = vrot.slane %v342_v56, 4  ;;  %v354_v61 = vrot.slane %v342_v56, 6 }
 0x2cd   :  { %v350_v58 = vmax.f32 %v342_v56, %v348_v57 }
 0x2cf   :  { %v353_v60 = vmax.f32 %v350_v58, %v351_v59 }
 0x2d1   :  { %v356_v0 = vmax.f32 %v353_v60, %v354_v61 }
 0x34d   :  { %v243_v39 = vpop.f32.mrf.mxu3 }
 0x34e   :  { %v247_v40 = vrot.slane %v243_v39, 6 }
 0x350   :  { %v249_v41 = vadd.f32 %v247_v40, %v73_v35 }
 0x352   :  { %487 = vtanh.f32 %v249_v41 }
 0x358   :  { %v488_v42 = vpop.eup %487 }
 0x359   :  { %251 = vst.msk [vmem:[#allocation2 + $0x8] sm:$0xc] %vm132_vm4, %v488_v42  ;;  %v253_v43 = vrot.slane %v488_v42, 2 }
 0x35b   :  { %471 = vmatmul.msk.f32.vlgmr.msrb.gmra.mxu0 %vm76_vm2, %v253_v43 }
 0x3d8   :  { %v273_v44 = vpop.f32.mrf.mxu0 }
 0x3d9   :  { %v277_v45 = vrot.slane %v273_v44, 4 }
 0x3db   :  { %v279_v46 = vadd.f32 %v277_v45, %v73_v35 }
 0x3dd   :  { %489 = vtanh.f32 %v279_v46 }
 0x3e3   :  { %v490_v47 = vpop.eup %489 }
 0x3e4   :  { %281 = vst.msk [vmem:[#allocation2 + $0x8] sm:$0x30] %vm163_vm5, %v490_v47  ;;  %v283_v48 = vrot.slane %v490_v47, 4 }
 0x3e6   :  { %472 = vmatmul.msk.f32.vlgmr.msra.gmra.mxu1 %vm76_vm2, %v283_v48 }
 0x463   :  { %v303_v49 = vpop.f32.mrf.mxu1 }
 0x464   :  { %v307_v50 = vrot.slane %v303_v49, 2 }
 0x466   :  { %v309_v51 = vadd.f32 %v307_v50, %v73_v35 }
 0x468   :  { %491 = vtanh.f32 %v309_v51 }
 0x46e   :  { %v492_v52 = vpop.eup %491 }
 0x46f   :  { %311 = vst.msk [vmem:[#allocation2 + $0x8] sm:$0xc0] %vm194_vm6, %v492_v52 }
 0x476   :  { %v313_v53 = vld [vmem:[#allocation2 + $0x8] sm:$0xff] }
 0x477   :  { %474 = vmatmul.msk.f32.gmra.mxu2 %vm76_vm2, %v313_v53 }
 0x4fa   :  { %v344_v62 = vpop.f32.mrf.mxu2 }
 0x4fb   :  { %v345_v63 = vadd.f32 %v476_v54, %v344_v62 }
 0x4fd   :  { %v357_v1 = vmax.f32 %v356_v0, %v345_v63  ;;  %v359_v2 = vrot.slane %v345_v63, 2  ;;  %v362_v4 = vrot.slane %v345_v63, 4  ;;  %v365_v6 = vrot.slane %v345_v63, 6 }
 0x4ff   :  { %v361_v3 = vmax.f32 %v357_v1, %v359_v2 }
 0x501   :  { %v364_v5 = vmax.f32 %v361_v3, %v362_v4 }
 0x503   :  { %v367_v7 = vmax.f32 %v364_v5, %v365_v6 }
 0x505   :  { %v368_v8 = vsub.f32 %v342_v56, %v367_v7  ;;  %v372_v9 = vrot.slane %v367_v7, 6  ;;  %v377_v10 = vrot.slane %v367_v7, 4  ;;  %v382_v11 = vrot.slane %v367_v7, 2 }
 0x506   :  { %v387_v20 = vsub.f32 %v345_v63, %v367_v7 }
 0x507   :  { %v369_v12 = vmul.f32 1.442695, %v368_v8  ;;  %v374_v13 = vsub.f32 %v342_v56, %v372_v9  ;;  %v379_v14 = vsub.f32 %v342_v56, %v377_v10  ;;  %v384_v15 = vsub.f32 %v342_v56, %v382_v11 }
 0x508   :  { %v390_v19 = vsub.f32 %v345_v63, %v372_v9  ;;  %v393_v21 = vsub.f32 %v345_v63, %v377_v10  ;;  %v396_v23 = vsub.f32 %v345_v63, %v382_v11  ;;  %v388_v24 = vmul.f32 1.442695, %v387_v20 }
 0x509   :  { %v375_v16 = vmul.f32 1.442695, %v374_v13  ;;  %v380_v17 = vmul.f32 1.442695, %v379_v14  ;;  %v385_v18 = vmul.f32 1.442695, %v384_v15  ;;  %493 = vpow2.f32 %v369_v12 }
 0x50a   :  { %v391_v22 = vmul.f32 1.442695, %v390_v19  ;;  %v394_v25 = vmul.f32 1.442695, %v393_v21  ;;  %v397_v28 = vmul.f32 1.442695, %v396_v23 }
 0x50b   :  { %495 = vpow2.f32 %v375_v16 }
 0x50c   :  { %497 = vpow2.f32 %v380_v17 }
 0x50d   :  { %499 = vpow2.f32 %v385_v18 }
 0x50e   :  { %501 = vpow2.f32 %v391_v22 }
 0x50f   :  { %v494_v26 = vpop.eup %493  ;;  %503 = vpow2.f32 %v388_v24 }
 0x510   :  { %505 = vpow2.f32 %v394_v25 }
 0x511   :  { %v496_v27 = vpop.eup %495  ;;  %507 = vpow2.f32 %v397_v28 }
 0x512   :  { %v498_v29 = vpop.eup %497  ;;  %v400_v30 = vrot.slane %v496_v27, 2 }
 0x513   :  { %v500_v31 = vpop.eup %499  ;;  %v404_v33 = vrot.slane %v498_v29, 4 }
 0x514   :  { %v402_v32 = vadd.f32 %v494_v26, %v400_v30  ;;  %v408_v35 = vrot.slane %v500_v31, 6  ;;  %v502_v36 = vpop.eup %501 }
 0x515   :  { %v504_v37 = vpop.eup %503  ;;  %v413_v41 = vrot.slane %v502_v36, 2 }
 0x516   :  { %v406_v34 = vadd.f32 %v404_v33, %v402_v32  ;;  %v506_v39 = vpop.eup %505 }
 0x517   :  { %v508_v42 = vpop.eup %507  ;;  %v417_v44 = vrot.slane %v506_v39, 4 }
 0x518   :  { %v410_v38 = vadd.f32 %v408_v35, %v406_v34  ;;  %v421_v46 = vrot.slane %v508_v42, 6 }
 0x51a   :  { %v411_v40 = vadd.f32 %v504_v37, %v410_v38 }
 0x51c   :  { %v415_v43 = vadd.f32 %v413_v41, %v411_v40 }
 0x51e   :  { %v419_v45 = vadd.f32 %v417_v44, %v415_v43 }
 0x520   :  { %v423_v47 = vadd.f32 %v421_v46, %v419_v45 }
 0x522   :  { %509 = vrcp.f32 %v423_v47 }
 0x528   :  { %v510_v48 = vpop.eup %509 }
 0x529   :  { %v425_v49 = vmul.f32 %v510_v48, %v423_v47 }
 0x52b   :  { %v426_v50 = vsub.f32 2.0, %v425_v49 }
 0x52d   :  { %v427_v51 = vmul.f32 %v510_v48, %v426_v50 }
 0x52f   :  { %v428_v52 = vmul.f32 %v427_v51, %v423_v47 }
 0x531   :  { %v429_v53 = vsub.f32 2.0, %v428_v52 }
 0x533   :  { %v430_v54 = vmul.f32 %v429_v53, %v427_v51 }
 0x535   :  { %v431_v55 = vmul.f32 %v494_v26, %v430_v54  ;;  %v435_v56 = vrot.slane %v430_v54, 6  ;;  %v440_v57 = vrot.slane %v430_v54, 4  ;;  %v445_v58 = vrot.slane %v430_v54, 2 }
 0x536   :  { %v450_v59 = vmul.f32 %v504_v37, %v430_v54 }
 0x537   :  { %433 = vst.msk [vmem:[%s644_s7] sm:$0x3] %vm432_vm7, %v431_v55  ;;  %v437_v60 = vmul.f32 %v496_v27, %v435_v56  ;;  %v442_v61 = vmul.f32 %v498_v29, %v440_v57  ;;  %v447_v62 = vmul.f32 %v500_v31, %v445_v58  ;;  %v452_v63 = vmul.f32 %v502_v36, %v435_v56 }
 0x538   :  { %451 = vst.msk [vmem:[%s644_s7 + $0x8] sm:$0x3] %vm432_vm7, %v450_v59  ;;  %v454_v0 = vmul.f32 %v506_v39, %v440_v57  ;;  %v456_v1 = vmul.f32 %v508_v42, %v445_v58 }
 0x539   :  { %439 = vst.msk [vmem:[%s644_s7] sm:$0xc] %vm438_vm8, %v437_v60 }
 0x53a   :  { %444 = vst.msk [vmem:[%s644_s7] sm:$0x30] %vm443_vm9, %v442_v61 }
 0x53b   :  { %449 = vst.msk [vmem:[%s644_s7] sm:$0xc0] %vm448_vm10, %v447_v62 }
 0x53c   :  { %453 = vst.msk [vmem:[%s644_s7 + $0x8] sm:$0xc] %vm438_vm8, %v452_v63 }
 0x53d   :  { %455 = vst.msk [vmem:[%s644_s7 + $0x8] sm:$0x30] %vm443_vm9, %v454_v0 }
 0x53e   :  { %457 = vst.msk [vmem:[%s644_s7 + $0x8] sm:$0xc0] %vm448_vm10, %v456_v1 }

</bundles_post_ra>
